<compile_context>
chip_gen: v5e
topology: v5e:2x2
jax: 0.10.0
libtpu: 0.0.40
codegen_flags: <defaults>
</compile_context>

<pallas_src>
import jax
import jax.numpy as jnp
from jax.experimental import pallas as pl
from jax.experimental.pallas import tpu as pltpu


def _copy_kernel(x_ref, o_ref):
    # Identity data-movement kernel: squeeze itself is metadata-only, so the
    # only "compute" is a VMEM tile copy.
    o_ref[...] = x_ref[...]


_LANE = 128
_SUBLANE = 8
# ~2 MiB per block -> (2 refs x 2 pipeline buffers) ~ 8 MiB VMEM: safe on all gens.
_TARGET_BLOCK_BYTES = 2 * 1024 * 1024
# Below one vreg-tile of data a kernel launch is pure overhead.
_MIN_PALLAS_ELEMS = _SUBLANE * _LANE  # 1024


def _pick_lane_width(total):
    """Largest lane-dense width (multiple of 128) dividing `total`, capped at 4096."""
    for lane in (4096, 2048, 1024, 512, 256, 128):
        if total % lane == 0:
            return lane
    return None


def _pallas_copy_2d(x2d, tm):
    """Tiled, pipelined copy of a lane-dense 2D array through a Pallas kernel."""
    rows, lane = x2d.shape
    grid = (pl.cdiv(rows, tm),)
    return pl.pallas_call(
        _copy_kernel,
        out_shape=jax.ShapeDtypeStruct((rows, lane), x2d.dtype),
        grid=grid,
        in_specs=[pl.BlockSpec((tm, lane), lambda i: (i, 0))],
        out_specs=pl.BlockSpec((tm, lane), lambda i: (i, 0)),
        compiler_params=pltpu.CompilerParams(
            dimension_semantics=("parallel",)),
    )(x2d)


def squeeze_last(x):
    """JAX/Pallas equivalent of torch `x.squeeze(dim=-1)` semantics:
    the last dim is removed iff it equals 1; otherwise a no-op."""
    if x.ndim == 0:
        return x
    if x.shape[-1] == 1:
        out_shape = x.shape[:-1]
    else:
        out_shape = x.shape  # torch.squeeze(dim=-1) is a no-op here

    total = 1
    for d in x.shape:
        total *= d

    lane = _pick_lane_width(total) if total >= _MIN_PALLAS_ELEMS else None
    if lane is None:
        # Degenerate / tiny / not factorable into full 128-lane rows:
        # the squeeze is metadata-only, so a bare reshape (zero data movement)
        # is the optimal path.
        return jnp.reshape(x, out_shape)

    rows = total // lane
    itemsize = jnp.dtype(x.dtype).itemsize
    target_rows = max(_SUBLANE, _TARGET_BLOCK_BYTES // (lane * itemsize))
    target_rows = (target_rows // _SUBLANE) * _SUBLANE
    # Block first-dim must be a multiple of 8 or span the whole array dim.
    tm = rows if rows <= target_rows else target_rows

    x2d = jnp.reshape(x, (rows, lane))       # contiguous copy: free to refactor lane-dense
    y2d = _pallas_copy_2d(x2d, tm)
    return jnp.reshape(y2d, out_shape)


if __name__ == "__main__":
    key = jax.random.PRNGKey(0)
    k1, k2, k3 = jax.random.split(key, 3)

    # Primary: small NCHW-style input with a trailing singleton dim.
    # (Too small for a kernel to be worthwhile -> metadata-only reshape path.)
    x = jax.random.normal(k1, (2, 4, 16, 1), dtype=jnp.float32)
    y = jax.block_until_ready(squeeze_last(x))
    assert y.shape == (2, 4, 16), y.shape
    assert jnp.allclose(y, x[..., 0]), "values mismatch after squeeze (small path)"

    # Larger input: exercises the tiled, lane-dense Pallas copy path.
    xb = jax.random.normal(k2, (8, 32, 64, 1), dtype=jnp.float32)
    yb = jax.block_until_ready(squeeze_last(xb))
    assert yb.shape == (8, 32, 64), yb.shape
    assert jnp.allclose(yb, xb[..., 0]), "values mismatch after squeeze (pallas path)"

    # No-op path: last dim != 1 -> output identical to input.
    x3 = jax.random.normal(k3, (2, 4, 16, 16), dtype=jnp.float32)
    y3 = jax.block_until_ready(squeeze_last(x3))
    assert y3.shape == x3.shape
    assert jnp.allclose(y3, x3), "no-op squeeze changed values"

    print("KERNEL_OK")
</pallas_src>

<mosaic_0001>
module attributes {stable_mosaic.version = 11 : i64} {
  func.func @_copy_kernel(%arg0: i32, %arg1: memref<4x4096xf32, #tpu.memory_space<vmem>>, %arg2: memref<4x4096xf32, #tpu.memory_space<vmem>>) attributes {dimension_semantics = [#tpu.dimension_semantics<parallel>], iteration_bounds = array<i64: 1>, scalar_prefetch = 0 : i64, scratch_operands = 0 : i64, tpu.core_type = #tpu.core_type<tc>, window_params = [{transform_indices = @transform_0, window_bounds = array<i64: 4, 4096>}, {transform_indices = @transform_1, window_bounds = array<i64: 4, 4096>}]} {
    %c0 = arith.constant 0 : index
    %c0_0 = arith.constant 0 : index
    %0 = vector.load %arg1[%c0, %c0_0] : memref<4x4096xf32, #tpu.memory_space<vmem>>, vector<4x4096xf32>
    %c0_1 = arith.constant 0 : index
    %c0_2 = arith.constant 0 : index
    %1 = vector.load %arg2[%c0_1, %c0_2] : memref<4x4096xf32, #tpu.memory_space<vmem>>, vector<4x4096xf32>
    tpu.vector_store %arg2[%c0_1, %c0_2], %0 {strides = array<i32>} : memref<4x4096xf32, #tpu.memory_space<vmem>>, vector<4x4096xf32>,
    return
  }
  func.func @transform_0(%arg0: i32) -> (i32, i32) {
    %c0_i32 = arith.constant 0 : i32
    %c0_i32_0 = arith.constant 0 : i32
    return %arg0, %c0_i32 : i32, i32
  }
  func.func @transform_1(%arg0: i32) -> (i32, i32) {
    %c0_i32 = arith.constant 0 : i32
    %c0_i32_0 = arith.constant 0 : i32
    return %arg0, %c0_i32 : i32, i32
  }
}

</mosaic_0001>

<bundles_post_ra>
// kernel: tpu_custom_call.1
= control target key start
LH: loop header
LB: loop body
LE: loop exit
PB: predicated region body
PF: predicated region fallthrough
CT: control target
= control target key end

     0   :  { %6 = vsyncpa [#allocation3], 0  ;;  %s144_s0 = inlined_call_operand.hbm [shape: f32[4,4096], index: 0, kind: input, shape index: {}]   ;;  %s145_s1 = inlined_call_operand.hbm [shape: f32[4,4096], index: 1, kind: output, shape index: {}]  }
   0x1   :  { %7 = vsyncpa [#allocation4], 0  ;;  %s13_s8 = sshll.u32 %s144_s0, 4  ;;  %s126_s9 = smov [#allocation2]   ;;  %s14_s8 = int_to_ptr.hbm [resolvable:$true] %s13_s8 }
   0x2   :  { %s15_s10 = sshll.u32 %s126_s9, 4  ;;  %s16_s10 = int_to_ptr.vmem [resolvable:$true] %s15_s10 }
   0x3   :  { %18 = dma.hbm_to_vmem [thread:$0]  %s14_s8, 2048, %s16_s10, [#allocation3]  }
   0x4   :  { %122 = dma.done.wait [#allocation3], 2048  }
   0x5   :  { %123 = vsyncadd [#allocation3], 4294965248  ;;  %v23_v0 = vld [vmem:[#allocation2] sm:$0xff]  ;;  %v24_v1 = vld [vmem:[#allocation2 + $0x8] sm:$0xff]  ;;  %s127_s0 = smov [#allocation5]   ;;  %s62_s14 = sshll.u32 %s145_s1, 4  ;;  %s63_s14 = int_to_ptr.hbm [resolvable:$true] %s62_s14 }
   0x6   :  { %v25_v2 = vld [vmem:[#allocation2 + $0x10] sm:$0xff]  ;;  %39 = vst [vmem:[#allocation5] sm:$0xff] %v23_v0  ;;  %v26_v3 = vld [vmem:[#allocation2 + $0x18] sm:$0xff]  ;;  %v27_v4 = vld [vmem:[#allocation2 + $0x20] sm:$0xff]  ;;  %s60_s11 = sshll.u32 %s127_s0, 4  ;;  %s61_s11 = int_to_ptr.vmem [resolvable:$true] %s60_s11 }
   0x7   :  { %40 = vst [vmem:[#allocation5 + $0x8] sm:$0xff] %v24_v1  ;;  %v28_v5 = vld [vmem:[#allocation2 + $0x28] sm:$0xff]  ;;  %v29_v6 = vld [vmem:[#allocation2 + $0x30] sm:$0xff]  ;;  %v30_v7 = vld [vmem:[#allocation2 + $0x38] sm:$0xff] }
   0x8   :  { %41 = vst [vmem:[#allocation5 + $0x10] sm:$0xff] %v25_v2  ;;  %v31_v8 = vld [vmem:[#allocation2 + $0x40] sm:$0xff]  ;;  %v32_v9 = vld [vmem:[#allocation2 + $0x48] sm:$0xff]  ;;  %v33_v10 = vld [vmem:[#allocation2 + $0x50] sm:$0xff] }
   0x9   :  { %42 = vst [vmem:[#allocation5 + $0x18] sm:$0xff] %v26_v3  ;;  %v34_v11 = vld [vmem:[#allocation2 + $0x58] sm:$0xff]  ;;  %v35_v12 = vld [vmem:[#allocation2 + $0x60] sm:$0xff]  ;;  %v36_v13 = vld [vmem:[#allocation2 + $0x68] sm:$0xff] }
   0xa   :  { %43 = vst [vmem:[#allocation5 + $0x20] sm:$0xff] %v27_v4  ;;  %v37_v14 = vld [vmem:[#allocation2 + $0x70] sm:$0xff]  ;;  %v38_v15 = vld [vmem:[#allocation2 + $0x78] sm:$0xff] }
   0xb   :  { %44 = vst [vmem:[#allocation5 + $0x28] sm:$0xff] %v28_v5 }
   0xc   :  { %45 = vst [vmem:[#allocation5 + $0x30] sm:$0xff] %v29_v6 }
   0xd   :  { %46 = vst [vmem:[#allocation5 + $0x38] sm:$0xff] %v30_v7 }
   0xe   :  { %47 = vst [vmem:[#allocation5 + $0x40] sm:$0xff] %v31_v8 }
   0xf   :  { %48 = vst [vmem:[#allocation5 + $0x48] sm:$0xff] %v32_v9 }
  0x10   :  { %49 = vst [vmem:[#allocation5 + $0x50] sm:$0xff] %v33_v10 }
  0x11   :  { %50 = vst [vmem:[#allocation5 + $0x58] sm:$0xff] %v34_v11 }
  0x12   :  { %51 = vst [vmem:[#allocation5 + $0x60] sm:$0xff] %v35_v12 }
  0x13   :  { %52 = vst [vmem:[#allocation5 + $0x68] sm:$0xff] %v36_v13 }
  0x14   :  { %53 = vst [vmem:[#allocation5 + $0x70] sm:$0xff] %v37_v14 }
  0x15   :  { %54 = vst [vmem:[#allocation5 + $0x78] sm:$0xff] %v38_v15 }
  0x16   :  { %65 = dma.vmem_to_hbm [thread:$0]  %s61_s11, 2048, %s63_s14, [#allocation4]  }
  0x17   :  { %124 = dma.done.wait [#allocation4], 2048  }
  0x18   :  { %125 = vsyncadd [#allocation4], 4294965248 }
  0x19   :  { %70 = vsyncpa [#allocation3], 1 }
  0x1a   :  { %71 = vsyncpa [#allocation4], 1 }

</bundles_post_ra>
